<compile_context>
chip_gen: v6e
topology: v6e:2x2x1
jax: 0.10.0
libtpu: 0.0.40
codegen_flags: <defaults>
</compile_context>

<pallas_src>
import functools

import jax
import jax.numpy as jnp
from jax.experimental import pallas as pl
from jax.experimental.pallas import tpu as pltpu


_MIN_PIXELS_FOR_PALLAS = 256   # below this: masked sub-lane stores + overhead dominate
_MAX_TP = 4096                 # pixel-tile upper bound (multiple of 128)


# ----------------------------------------------------------------------------
# Kernel
# ----------------------------------------------------------------------------
def _fs_relation_kernel(x_ref, w_ref, shift_ref, scene_ref, out_ref, *, cout):
    """One (batch, pixel-tile) grid step.

    x_ref:     (1, Cin, TP)   feature pixels, channels-major (NCHW-native view); any
                              float dtype -- cast to bf16 in-kernel (no wrapper pass)
    w_ref:     (2*Cout, Cin)  bf16 fused [content ; re-encoder] 1x1 conv weights
                              (inference-BN scale pre-folded into the rows)
    shift_ref: (2*Cout, 1)    f32  folded conv-bias + BN shift
    scene_ref: (1, 1, Cout)   f32  encoded scene feature, lane-dense
    out_ref:   (1, Cout, TP)  refined (gated) feature, stored as out dtype (bf16)
    """
    x = x_ref[0].astype(jnp.bfloat16)                        # (Cin, TP)
    w = w_ref[...]                                           # (2*Cout, Cin) bf16

    # Both 1x1 convs share the same LHS -> one wide MXU matmul, f32 accumulation.
    y = jnp.dot(w, x, preferred_element_type=jnp.float32)    # (2*Cout, TP) f32
    y = jnp.maximum(y + shift_ref[...], 0.0)                 # bias + BN shift, ReLU

    c = y[:cout]                                             # content feature  (Cout, TP)
    f = y[cout:]                                             # re-encoded feat  (Cout, TP)

    # relation = sigmoid( scene . content ) per pixel, computed on the MXU
    # ((1,Cout) x (Cout,TP)) so the f32 VPU epilogue stays light; sigmoid -> EUP.
    s = scene_ref[0]                                         # (1, Cout) f32
    rel = jax.nn.sigmoid(jnp.dot(s, c, preferred_element_type=jnp.float32))  # (1, TP)

    out_ref[0] = (rel * f).astype(out_ref.dtype)


# ----------------------------------------------------------------------------
# Tiling / VMEM sizing helpers (generation-aware)
# ----------------------------------------------------------------------------
def _vmem_capacity_bytes():
    try:
        cap = getattr(pltpu.get_tpu_info(), "vmem_capacity_bytes", None)
        if cap:
            return int(cap)
    except Exception:
        pass
    return 64 << 20   # conservative default (v7x per-TensorCore VMEM)


def _tile_working_set_bytes(tp, cin, cout, x_bytes):
    return (2 * tp * cin * x_bytes        # double-buffered input tile
            + 2 * tp * cout * 2           # double-buffered bf16 output tile
            + 2 * cout * cin * 2          # resident fused weights (bf16)
            + 2 * cout * 128 * 4          # shift column (lane-padded in VMEM)
            + 3 * 2 * cout * tp * 4)      # in-kernel f32 intermediates (y / c,f / gate)


def _choose_pixel_tile(hw, cin, cout, x_bytes, vmem_cap):
    budget = 3 * vmem_cap // 8            # keep the per-step working set well under cap
    if hw <= _MAX_TP and _tile_working_set_bytes(hw, cin, cout, x_bytes) <= budget:
        return hw                          # one full-extent tile per batch element
    for tp in (4096, 2048, 1024, 512, 256, 128):
        if tp <= hw and _tile_working_set_bytes(tp, cin, cout, x_bytes) <= budget:
            return tp
    return 128


# ----------------------------------------------------------------------------
# Per-level wrappers
# ----------------------------------------------------------------------------
def fs_relation_level_pallas(x_nchw, scene_enc, w_cat, shift_cat, out_dtype):
    """One pyramid level via the fused Pallas kernel.

    x_nchw:    (B, Cin, H, W)
    scene_enc: (B, Cout)       (already passed through the scene encoder)
    w_cat:     (2*Cout, Cin)   BN-scale-folded fused conv weights
    shift_cat: (2*Cout,)       folded conv-bias + BN shift
    returns    (B, Cout, H, W) in out_dtype
    """
    B, Cin, H, W = x_nchw.shape
    Cout2 = w_cat.shape[0]
    Cout = Cout2 // 2
    HW = H * W

    vmem_cap = _vmem_capacity_bytes()
    x_bytes = jnp.dtype(x_nchw.dtype).itemsize
    TP = _choose_pixel_tile(HW, Cin, Cout, x_bytes, vmem_cap)

    # NCHW -> (B, Cin, H*W): free reshape. No transpose, no pad, no dtype-cast pass:
    # the f32->bf16 cast happens inside the kernel.
    x = x_nchw.reshape(B, Cin, HW)
    w_cat = w_cat.astype(jnp.bfloat16)                           # tiny, one-time
    shift_col = shift_cat.reshape(Cout2, 1).astype(jnp.float32)
    scene_row = scene_enc.reshape(B, 1, Cout).astype(jnp.float32)

    # Ragged last tile: OOB pixels are computed on garbage and discarded on write
    # (each pixel is an independent column of the matmuls, so valid pixels are exact).
    grid = (B, pl.cdiv(HW, TP))

    out_bytes = jnp.dtype(out_dtype).itemsize
    cost = pl.CostEstimate(
        flops=int(B * HW * (2 * Cout2 * Cin + 2 * Cout)),
        transcendentals=int(B * HW),
        bytes_accessed=int(B * Cin * HW * x_bytes + B * Cout * HW * out_bytes
                           + Cout2 * Cin * 2 + Cout2 * 4 + B * Cout * 4),
    )

    vmem_limit = int(min(
        3 * vmem_cap // 4,   # headroom: ~48 MiB on v7x, ~96 MiB on v5e/v6e
        max(2 * _tile_working_set_bytes(TP, Cin, Cout, x_bytes), 8 << 20)))

    out = pl.pallas_call(
        functools.partial(_fs_relation_kernel, cout=Cout),
        out_shape=jax.ShapeDtypeStruct((B, Cout, HW), out_dtype),
        grid_spec=pltpu.PrefetchScalarGridSpec(
            num_scalar_prefetch=0,
            grid=grid,
            in_specs=[
                pl.BlockSpec((1, Cin, TP), lambda b, p: (b, 0, p)),
                pl.BlockSpec((Cout2, Cin), lambda b, p: (0, 0)),
                pl.BlockSpec((Cout2, 1), lambda b, p: (0, 0)),
                pl.BlockSpec((1, 1, Cout), lambda b, p: (b, 0, 0)),
            ],
            out_specs=pl.BlockSpec((1, Cout, TP), lambda b, p: (b, 0, p)),
        ),
        compiler_params=pltpu.CompilerParams(
            dimension_semantics=("parallel", "parallel"),
            vmem_limit_bytes=vmem_limit,
        ),
        cost_estimate=cost,
    )(x, w_cat, shift_col, scene_row)

    return out.reshape(B, Cout, H, W)


def _fs_relation_level_jnp(x_nchw, scene_enc, w_cat, shift_cat, out_dtype):
    """Tiny-level fallback (H*W < threshold): plain XLA, same folded-weight math."""
    B, Cin, H, W = x_nchw.shape
    Cout = w_cat.shape[0] // 2
    x = x_nchw.reshape(B, Cin, H * W).astype(jnp.float32)
    y = jnp.einsum("oc,bcp->bop", w_cat.astype(jnp.float32), x)
    y = jnp.maximum(y + shift_cat.astype(jnp.float32)[None, :, None], 0.0)
    c, f = y[:, :Cout], y[:, Cout:]
    rel = jax.nn.sigmoid(
        jnp.sum(c * scene_enc.astype(jnp.float32)[:, :, None], axis=1, keepdims=True))
    return (rel * f).astype(out_dtype).reshape(B, Cout, H, W)


# ----------------------------------------------------------------------------
# BN folding + full forward
# ----------------------------------------------------------------------------
def _fold_bn_into_conv(w, bias, gamma, beta, mean, var, eps=1e-5):
    """Fold inference-mode BatchNorm into the 1x1 conv.

    w: (Cin, Cout). Returns w_folded in kernel orientation (Cout, Cin) and shift (Cout,).
    """
    scale = gamma / jnp.sqrt(var + eps)                 # (Cout,)
    w_folded = (w * scale[None, :]).T                   # (Cout, Cin)
    shift = (bias - mean) * scale + beta                # (Cout,)
    return w_folded, shift


def fs_relation_forward(scene_feature, features, params, out_dtype=jnp.bfloat16):
    """FSRelation.forward (scale_aware_proj=False), inference-mode BatchNorm.

    scene_feature: (B, Cs, 1, 1)  NCHW
    features:      list of (B, Cin_i, H_i, W_i)  NCHW
    returns:       list of (B, Cout, H_i, W_i)   NCHW (out_dtype, default bf16)
    """
    B = scene_feature.shape[0]

    # Scene encoder: Conv1x1 -> ReLU -> Conv1x1 on a 1x1 "image" == a tiny matmul.
    # Plain XLA; a pallas_call here would be pure launch overhead.
    s = scene_feature.reshape(B, -1)
    h = jnp.maximum(s @ params["scene_w1"] + params["scene_b1"], 0.0)
    scene_enc = h @ params["scene_w2"] + params["scene_b2"]          # (B, Cout)

    outs = []
    for x, lvl in zip(features, params["levels"]):
        wc, shc = _fold_bn_into_conv(lvl["c_w"], lvl["c_bias"], lvl["c_gamma"],
                                     lvl["c_beta"], lvl["c_mean"], lvl["c_var"])
        wf, shf = _fold_bn_into_conv(lvl["f_w"], lvl["f_bias"], lvl["f_gamma"],
                                     lvl["f_beta"], lvl["f_mean"], lvl["f_var"])
        w_cat = jnp.concatenate([wc, wf], axis=0)        # (2*Cout, Cin)
        shift_cat = jnp.concatenate([shc, shf], axis=0)  # (2*Cout,)
        hw = x.shape[2] * x.shape[3]
        if hw >= _MIN_PIXELS_FOR_PALLAS:
            outs.append(fs_relation_level_pallas(x, scene_enc, w_cat, shift_cat,
                                                 out_dtype))
        else:
            outs.append(_fs_relation_level_jnp(x, scene_enc, w_cat, shift_cat,
                                               out_dtype))
    return outs


# ----------------------------------------------------------------------------
# Pure-JAX f32 reference (for correctness check)
# ----------------------------------------------------------------------------
def _fold_bn_ref(conv_bias, gamma, beta, mean, var, eps=1e-5):
    scale = gamma / jnp.sqrt(var + eps)
    shift = (conv_bias - mean) * scale + beta
    return scale.reshape(1, -1), shift.reshape(1, -1)


def reference_forward(scene_feature, features, params):
    B = scene_feature.shape[0]
    s = scene_feature.reshape(B, -1)
    h = jnp.maximum(s @ params["scene_w1"] + params["scene_b1"], 0.0)
    scene_enc = h @ params["scene_w2"] + params["scene_b2"]          # (B, Cout)

    outs = []
    for x, lvl in zip(features, params["levels"]):
        B_, Cin, H, W = x.shape
        xp = jnp.transpose(x, (0, 2, 3, 1)).reshape(B_, H * W, Cin)
        sc, bc = _fold_bn_ref(lvl["c_bias"], lvl["c_gamma"], lvl["c_beta"],
                              lvl["c_mean"], lvl["c_var"])
        sf, bf = _fold_bn_ref(lvl["f_bias"], lvl["f_gamma"], lvl["f_beta"],
                              lvl["f_mean"], lvl["f_var"])
        c = jnp.maximum(xp @ lvl["c_w"] * sc + bc, 0.0)
        f = jnp.maximum(xp @ lvl["f_w"] * sf + bf, 0.0)
        rel = jax.nn.sigmoid(jnp.sum(c * scene_enc[:, None, :], axis=-1,
                                     keepdims=True))
        out = rel * f
        Cout = out.shape[-1]
        outs.append(jnp.transpose(out.reshape(B_, H, W, Cout), (0, 3, 1, 2)))
    return outs


# ----------------------------------------------------------------------------
# Deterministic parameter construction + demo
# ----------------------------------------------------------------------------
def make_params(key, scene_channels, in_channels_list, out_channels):
    keys = iter(jax.random.split(key, 8 + 12 * len(in_channels_list)))

    def nrm(shape, scale=0.1):
        return scale * jax.random.normal(next(keys), shape, dtype=jnp.float32)

    params = {
        "scene_w1": nrm((scene_channels, out_channels)),
        "scene_b1": nrm((1, out_channels)),
        "scene_w2": nrm((out_channels, out_channels)),
        "scene_b2": nrm((1, out_channels)),
        "levels": [],
    }
    for c in in_channels_list:
        lvl = {
            "c_w": nrm((c, out_channels)),
            "c_bias": nrm((out_channels,)),
            "c_gamma": 1.0 + nrm((out_channels,)),
            "c_beta": nrm((out_channels,)),
            "c_mean": nrm((out_channels,)),
            "c_var": jax.random.uniform(next(keys), (out_channels,),
                                        minval=0.5, maxval=1.5,
                                        dtype=jnp.float32),
            "f_w": nrm((c, out_channels)),
            "f_bias": nrm((out_channels,)),
            "f_gamma": 1.0 + nrm((out_channels,)),
            "f_beta": nrm((out_channels,)),
            "f_mean": nrm((out_channels,)),
            "f_var": jax.random.uniform(next(keys), (out_channels,),
                                        minval=0.5, maxval=1.5,
                                        dtype=jnp.float32),
        }
        params["levels"].append(lvl)
    return params


if __name__ == "__main__":
    B = 2
    scene_channels = 8
    in_channels_list = [4, 8]   # NOTE: production FSRelation uses ~256; tiny Cin here
    out_channels = 32           # only exercises a small corner of the MXU (demo-sized).

    key = jax.random.PRNGKey(0)
    k_scene, k_f0, k_f1, k_params = jax.random.split(key, 4)

    scene_feature = jax.random.normal(k_scene, (B, scene_channels, 1, 1),
                                      dtype=jnp.float32)
    features = [
        # 16x16 = 256 pixels -> Pallas kernel path
        jax.random.normal(k_f0, (B, in_channels_list[0], 16, 16), dtype=jnp.float32),
        # 8x8 = 64 pixels -> tiny-level jnp fallback path
        jax.random.normal(k_f1, (B, in_channels_list[1], 8, 8), dtype=jnp.float32),
    ]
    params = make_params(k_params, scene_channels, in_channels_list, out_channels)

    outs = fs_relation_forward(scene_feature, features, params)
    outs = [jax.block_until_ready(o) for o in outs]

    refs = reference_forward(scene_feature, features, params)
    for o, r in zip(outs, refs):
        assert o.shape == r.shape
        # bf16 matmul inputs + bf16 output (f32 accumulation) -> small drift vs the
        # f32 reference.
        assert jnp.allclose(o.astype(jnp.float32), r, atol=2e-2, rtol=2e-2)

    print("KERNEL_OK")
</pallas_src>

<mosaic_0001>
module attributes {stable_mosaic.version = 11 : i64} {
  func.func @_fs_relation_kernel(%arg0: i32, %arg1: i32, %arg2: memref<1x4x256xf32, #tpu.memory_space<vmem>>, %arg3: memref<64x4xbf16, #tpu.memory_space<vmem>>, %arg4: memref<64x1xf32, #tpu.memory_space<vmem>>, %arg5: memref<1x1x32xf32, #tpu.memory_space<vmem>>, %arg6: memref<1x32x256xbf16, #tpu.memory_space<vmem>>) attributes {dimension_semantics = [#tpu.dimension_semantics<parallel>, #tpu.dimension_semantics<parallel>], iteration_bounds = array<i64: 2, 1>, scalar_prefetch = 0 : i64, scratch_operands = 0 : i64, tpu.core_type = #tpu.core_type<tc>, window_params = [{transform_indices = @transform_0, window_bounds = array<i64: 1, 4, 256>}, {pipeline_mode = #tpu.pipeline_mode<synchronous>, transform_indices = @transform_1, window_bounds = array<i64: 64, 4>}, {pipeline_mode = #tpu.pipeline_mode<synchronous>, transform_indices = @transform_2, window_bounds = array<i64: 64, 1>}, {transform_indices = @transform_3, window_bounds = array<i64: 1, 1, 32>}, {transform_indices = @transform_4, window_bounds = array<i64: 1, 32, 256>}]} {
    %c0 = arith.constant 0 : index
    %c0_0 = arith.constant 0 : index
    %c0_1 = arith.constant 0 : index
    %0 = vector.load %arg2[%c0, %c0_0, %c0_1] : memref<1x4x256xf32, #tpu.memory_space<vmem>>, vector<1x4x256xf32>
    %1 = vector.shape_cast %0 : vector<1x4x256xf32> to vector<4x256xf32>
    %2 = arith.truncf %1 : vector<4x256xf32> to vector<4x256xbf16>
    %c0_2 = arith.constant 0 : index
    %c0_3 = arith.constant 0 : index
    %3 = vector.load %arg3[%c0_2, %c0_3] : memref<64x4xbf16, #tpu.memory_space<vmem>>, vector<64x4xbf16>
    %cst = arith.constant dense<0.000000e+00> : vector<64x256xf32>
    %4 = tpu.matmul %3, %2, %cst {dimension_numbers = #tpu.dot_dimension_numbers<[1], [0], [0], [1], [0, 0, 1, 1], [], []>} : vector<64x4xbf16>, vector<4x256xbf16>, vector<64x256xf32> -> vector<64x256xf32>
    %c0_4 = arith.constant 0 : index
    %c0_5 = arith.constant 0 : index
    %5 = vector.load %arg4[%c0_4, %c0_5] : memref<64x1xf32, #tpu.memory_space<vmem>>, vector<64x1xf32>
    %6 = vector.broadcast %5 : vector<64x1xf32> to vector<64x256xf32>
    %7 = arith.addf %4, %6 : vector<64x256xf32>
    %cst_6 = arith.constant 0.000000e+00 : f32
    %8 = vector.broadcast %cst_6 : f32 to vector<64x256xf32>
    %9 = arith.maximumf %7, %8 : vector<64x256xf32>
    %10 = vector.extract_strided_slice %9 {offsets = [0, 0], sizes = [32, 256], strides = [1, 1]} : vector<64x256xf32> to vector<32x256xf32>
    %11 = vector.extract_strided_slice %9 {offsets = [32, 0], sizes = [32, 256], strides = [1, 1]} : vector<64x256xf32> to vector<32x256xf32>
    %c0_7 = arith.constant 0 : index
    %c0_8 = arith.constant 0 : index
    %c0_9 = arith.constant 0 : index
    %12 = vector.load %arg5[%c0_7, %c0_8, %c0_9] : memref<1x1x32xf32, #tpu.memory_space<vmem>>, vector<1x1x32xf32>
    %13 = vector.shape_cast %12 : vector<1x1x32xf32> to vector<1x32xf32>
    %cst_10 = arith.constant dense<0.000000e+00> : vector<1x256xf32>
    %14 = tpu.matmul %13, %10, %cst_10 {dimension_numbers = #tpu.dot_dimension_numbers<[1], [0], [0], [1], [0, 0, 1, 1], [], []>} : vector<1x32xf32>, vector<32x256xf32>, vector<1x256xf32> -> vector<1x256xf32>
    %15 = arith.negf %14 : vector<1x256xf32>
    %16 = math.exp %15 : vector<1x256xf32>
    %cst_11 = arith.constant 1.000000e+00 : f32
    %17 = vector.broadcast %cst_11 : f32 to vector<1x256xf32>
    %18 = arith.addf %17, %16 : vector<1x256xf32>
    %19 = arith.divf %17, %18 : vector<1x256xf32>
    %20 = vector.broadcast %19 : vector<1x256xf32> to vector<32x256xf32>
    %21 = arith.mulf %20, %11 : vector<32x256xf32>
    %22 = arith.truncf %21 : vector<32x256xf32> to vector<32x256xbf16>
    %c0_12 = arith.constant 0 : index
    %c0_13 = arith.constant 0 : index
    %c0_14 = arith.constant 0 : index
    %23 = vector.load %arg6[%c0_12, %c0_13, %c0_14] : memref<1x32x256xbf16, #tpu.memory_space<vmem>>, vector<1x32x256xbf16>
    %24 = vector.shape_cast %23 : vector<1x32x256xbf16> to vector<32x256xbf16>
    %25 = vector.shape_cast %22 : vector<32x256xbf16> to vector<1x32x256xbf16>
    tpu.vector_store %arg6[%c0_12, %c0_13, %c0_14], %25 {strides = array<i32>} : memref<1x32x256xbf16, #tpu.memory_space<vmem>>, vector<1x32x256xbf16>,
    return
  }
  func.func @transform_0(%arg0: i32, %arg1: i32) -> (i32, i32, i32) {
    %c0_i32 = arith.constant 0 : i32
    %c0_i32_0 = arith.constant 0 : i32
    return %arg0, %c0_i32, %arg1 : i32, i32, i32
  }
  func.func @transform_1(%arg0: i32, %arg1: i32) -> (i32, i32) {
    %c0_i32 = arith.constant 0 : i32
    %c0_i32_0 = arith.constant 0 : i32
    %c0_i32_1 = arith.constant 0 : i32
    return %c0_i32, %c0_i32_0 : i32, i32
  }
  func.func @transform_2(%arg0: i32, %arg1: i32) -> (i32, i32) {
    %c0_i32 = arith.constant 0 : i32
    %c0_i32_0 = arith.constant 0 : i32
    %c0_i32_1 = arith.constant 0 : i32
    return %c0_i32, %c0_i32_0 : i32, i32
  }
  func.func @transform_3(%arg0: i32, %arg1: i32) -> (i32, i32, i32) {
    %c0_i32 = arith.constant 0 : i32
    %c0_i32_0 = arith.constant 0 : i32
    %c0_i32_1 = arith.constant 0 : i32
    return %arg0, %c0_i32, %c0_i32_0 : i32, i32, i32
  }
  func.func @transform_4(%arg0: i32, %arg1: i32) -> (i32, i32, i32) {
    %c0_i32 = arith.constant 0 : i32
    %c0_i32_0 = arith.constant 0 : i32
    return %arg0, %c0_i32, %arg1 : i32, i32, i32
  }
}

</mosaic_0001>

<bundles_post_ra>
// kernel: tpu_custom_call.1
= control target key start
LH: loop header
LB: loop body
LE: loop exit
PB: predicated region body
PF: predicated region fallthrough
CT: control target
= control target key end

     0   :  { %9 = vsyncpa [#allocation3], 0  ;;  %s1049_s0 = inlined_call_operand.vmem [shape: f32[2,4,256], index: 0, kind: input, shape index: {}]   ;;  %s1050_s1 = inlined_call_operand.vmem [shape: bf16[64,4], index: 1, kind: input, shape index: {}]   ;;  %s1051_s2 = inlined_call_operand.vmem [shape: f32[64,1], index: 2, kind: input, shape index: {}]   ;;  %s1052_s3 = inlined_call_operand.vmem [shape: f32[2,1,32], index: 3, kind: input, shape index: {}]   ;;  %s1053_s4 = inlined_call_operand.hbm [shape: bf16[2,32,256], index: 4, kind: output, shape index: {}]  }
   0x1   :  { %11 = vsyncpa [#allocation3 + $0x1], 0  ;;  %s888_s15 = smov 0   ;;  %s890_s16 = smov 0  }
   0x2   :  { %s892_s17 = smov 0   ;;  %s894_s18 = smov 0  }
   0x3   :  { %s896_s19 = smov 0   ;;  %s898_s20 = smov 0  }
   0x4 LB: > { %s669_s21 = sadd.s32 4294967295, %s856_s20   ;;  %s670_s22 = sadd.s32 4294967294, %s856_s20   ;;  %s856_s20 = sphi %s898_s20, %s17_s20   ;;  %s852_s19 = sphi %s896_s19, %s1060_s19   ;;  %s848_s18 = sphi %s894_s18, %s1059_s18   ;;  %s844_s17 = sphi %s892_s17, %s1058_s17   ;;  %s840_s16 = sphi %s890_s16, %s1057_s16   ;;  %s836_s15 = sphi %s888_s15, %s1056_s15  }
   0x5   : > { %s29_s23 = sadd.s32 1, %s852_s19  ;;  %s134_s24 = sadd.s32 1, %s844_s17 }
   0x6   : > { %p31_p0 = scmp.ge.s32.totalorder %s29_s23, 2  ;;  %p144_p1 = scmp.ne.s32.totalorder %s844_s17, %s840_s16 }
   0x7   : > { %p145_p2 = scmp.eq.s32.totalorder %s669_s21, 1  ;;  %p150_p3 = scmp.ne.s32.totalorder %s840_s16, %s836_s15 }
   0x8   : > { %s1062_s23 = smov (%p31_p0, %s29_s23), 0  ;;  %p151_p5 = scmp.eq.s32.totalorder %s670_s22, 1 }
   0x9   : > { %p928_p4 = por %p145_p2, %p144_p1  ;;  %s129_s26 = ssub.s32 %s852_s19, %s1062_s23 }
   0xa   : > { %p673_p6 = scmp.ge.s32.totalorder %s856_s20, 1  ;;  %p132_p7 = scmp.eq.s32.totalorder %s129_s26, 0 }
   0xb   : > { %p935_p8 = por %p151_p5, %p150_p3  ;;  %p194_p9 = scmp.lt.s32.totalorder %s856_s20, 3 }
   0xc   : > { %s941_s28 = scalar_select %p132_p7, %s844_s17, %s134_s24  }
   0xd   : > { %p195_p10 = pnand %p673_p6, %p194_p9 }
   0xe   : > { %p228_p11 = scmp.lt.s32.totalorder (!%p195_p10), %s848_s18, 1  ;;  %s703_s6 = sshll.u32 (!%p195_p10), %s848_s18, 9 }
   0xf   : > { %198 = sbr.rel (%p195_p10) target bundleno = 500 (0x1f4), region = 36  ;;  %s860_s13 = smov (!%p195_p10), [#allocation2]  }
  0x10   : > { %s784_s14 = sshll.u32 (!%p195_p10), %s860_s13, 4  ;;  %s785_s14 = int_to_ptr.vmem [resolvable:$false] %s784_s14 }
  0x11   : > { %s786_s21 = scalar_lea.vmem (!%p195_p10), %s785_s14, 1024 }
  0x14   : > { %v858_v0 = vmov 0   ;;  %s945_s29 = scalar_select %p228_p11, %s848_s18, 1  ;;  %v257_v1 = vld [vmem:[%s1051_s2 + $0x8] sm:$0xff]  ;;  %v259_v2 = vld [vmem:[%s1051_s2 + $0x18] sm:$0xff]  ;;  %vm337_vm0 = vcmask 1041408   ;;  %v256_v4 = vld [vmem:[%s1051_s2] sm:$0xff] }
  0x15   : > { %376 = vmatprep.mubr.bf16.mxu0 %v858_v0  ;;  %406 = vmatprep.mubr.bf16.mxu1 %v858_v0  ;;  %v258_v5 = vld [vmem:[%s1051_s2 + $0x10] sm:$0xff]  ;;  %v260_v10 = vld [vmem:[%s1051_s2 + $0x20] sm:$0xff]  ;;  %v261_v11 = vld [vmem:[%s1051_s2 + $0x28] sm:$0xff]  ;;  %vm324_vm1 = vcmask 31744   ;;  %v859_v18 = vmov 0.0   ;;  %vm434_vm2 = vcmask 261120  }
  0x16   : > { %766 = vset.pattern.permute.xlu1 %v858_v0  ;;  %765 = vset.pattern.permute.xlu0 %v858_v0  ;;  %s698_s30 = sshll.u32 %s945_s29, 3  ;;  %v768_v12 = vld [vmem:[%s1050_s1] sm:$0xff]   ;;  %v770_v13 = vld [vmem:[%s1050_s1 + $0x18] sm:$0xff]   ;;  %v262_v14 = vld [vmem:[%s1051_s2 + $0x30] sm:$0xff] }
  0x17   : > { %s235_s11 = scalar_lea.vmem %s1049_s0, %s698_s30  ;;  %271 = vperm.xlu1 %766, %v257_v1   ;;  %281 = vperm.xlu0 %765, %v259_v2   ;;  %v263_v15 = vld [vmem:[%s1051_s2 + $0x38] sm:$0xff]  ;;  %v769_v16 = vld [vmem:[%s1050_s1 + $0x8] sm:$0xff]   ;;  %v771_v17 = vld [vmem:[%s1050_s1 + $0x10] sm:$0xff]   ;;  %s239_s30 = scalar_lea.vmem %s1052_s3, %s945_s29 }
  0x18   : > { %v242_v3 = vld [vmem:[%s235_s11] sm:$0xff]  ;;  %s224_s29 = sand.u32 1, %s840_s16   ;;  %s998_s11 = scalar_lea.hbm %s1053_s4, %s703_s6 }
  0x19   : > { %v244_v6 = vcombine.high %v242_v3, %v242_v3  ;;  %v246_v7 = vpack.c.bf16 %v242_v3, %v242_v3  ;;  %v433_v47 = vld [vmem:[%s239_s30] sm:$0x1]  ;;  %s674_s5 = sshll.u32 %s224_s29, 5  ;;  %s1004_s18 = scalar_lea.sflag [#allocation3], %s224_s29 }
  0x1a   : > { %s226_s7 = scalar_lea.vmem [#allocation2], %s674_s5 }
  0x1b   : > { %v247_v8 = vpack.c.bf16 %v244_v6, %v244_v6  ;;  %v339_v9 = vsel %vm337_vm0, %v246_v7, 0  ;;  %266 = vperm.xlu1 %766, %v256_v4   ;;  %276 = vperm.xlu0 %765, %v258_v5   ;;  %s581_s8 = sshll.u32 %s226_s7, 4  ;;  %s1000_s8 = int_to_ptr.vmem [resolvable:$true] %s581_s8 }
  0x1c   : > { %s780_s12 = scalar_lea.vmem %s1000_s8, 512  ;;  %p787_p1 = scmp.lt.s32.totalorder %s1000_s8, %s785_s14 }
  0x1d   : > { %681 = vmatprep.subr.msk.bf16.mxu0 %vm337_vm0, %v247_v8  ;;  %704 = vmatprep.subr.msk.bf16.mxu1 %vm337_vm0, %v247_v8  ;;  %p781_p12 = scmp.ne.s32.totalorder %s1000_s8, %s780_s12  ;;  %p788_p2 = scmp.lt.s32.totalorder %s786_s21, %s780_s12 }
  0x1e   : > { %359 = vmatpush1.bf16.msra.mxu0 %v339_v9  ;;  %705 = vmatpush1.bf16.msra.mxu1 %v339_v9 }
  0x1f   : > { %286 = vperm.xlu0 %765, %v260_v10   ;;  %291 = vperm.xlu1 %766, %v261_v11   ;;  %p782_p13 = pnand %p781_p12, %p928_p4  ;;  %p789_p3 = por %p788_p2, %p787_p1 }
  0x21   : > { %682 = vmatmul.mubr.msk.bf16.vlgmr.msra.gmra.mxu0 %vm324_vm1, %v768_v12  ;;  %685 = vmatmul.mubr.msk.bf16.vlgmr.msra.gmra.mxu1 %vm324_vm1, %v770_v13  ;;  %p783_p0 = pneg %p782_p13 }
  0x22   : > { %386 = vmatprep.mubr.bf16.mxu0 %v858_v0  ;;  %502 = vmatprep.mubr.f32.mxu1 %v859_v18 }
  0x23   : > { %296 = vperm.xlu0 %765, %v262_v14   ;;  %301 = vperm.xlu1 %766, %v263_v15   ;;  %p790_p5 = pnand %p789_p3, %p783_p0 }
  0x29   : > { %683 = vmatmul.mubr.msk.bf16.gmra.mxu0 %vm324_vm1, %v769_v16 }
  0x2a   : > { %396 = vmatprep.mubr.bf16.mxu0 %v858_v0  ;;  %v521_v0 = vlaneseq }
  0x2c   : > { %v522_v2 = vshrl.u32 %v521_v0, 7 }
  0x2e   : > { %v523_v7 = vsub.s32 0, %v522_v2 }
  0x31   : > { %684 = vmatmul.mubr.msk.bf16.gmra.mxu0 %vm324_vm1, %v771_v17 }
  0x92   : > { %v282_v23 = vpop.permute.xlu0 %281  ;;  %v272_v26 = vpop.permute.xlu1 %271 }
  0x96   : > { %v277_v28 = vpop.permute.xlu0 %276  ;;  %v267_v34 = vpop.permute.xlu1 %266 }
  0x9a   : > { %v287_v61 = vpop.permute.xlu0 %286  ;;  %v292_v63 = vpop.permute.xlu1 %291 }
  0x9e   : > { %v297_v3 = vpop.permute.xlu0 %296  ;;  %v302_v4 = vpop.permute.xlu1 %301 }
  0xe1   : > { %v378_v19 = vpop.f32.mrf.mxu0  ;;  %v408_v48 = vpop.f32.mrf.mxu1 }
  0xe2   : > { %v379_v41 = vadd.f32 %v378_v19, %v267_v34  ;;  %v409_v6 = vadd.f32 %v408_v48, %v297_v3 }
  0xe3   : > { %v380_v20 = vpop.f32.mrf.mxu0  ;;  %v410_v49 = vpop.f32.mrf.mxu1 }
  0xe4   : > { %v381_v39 = vadd.f32 %v380_v20, %v267_v34  ;;  %v417_v46 = vmax.f32 %v379_v41, 0.0  ;;  %v411_v8 = vadd.f32 %v410_v49, %v297_v3  ;;  %v429_v16 = vmax.f32 %v409_v6, 0.0 }
  0xe5   : > { %v382_v21 = vpop.f32.mrf.mxu0  ;;  %v412_v50 = vpop.f32.mrf.mxu1 }
  0xe6   : > { %v383_v37 = vadd.f32 %v382_v21, %v272_v26  ;;  %v418_v45 = vmax.f32 %v381_v39, 0.0  ;;  %v413_v9 = vadd.f32 %v412_v50, %v302_v4  ;;  %v430_v19 = vmax.f32 %v411_v8, 0.0 }
  0xe7   : > { %v384_v22 = vpop.f32.mrf.mxu0  ;;  %v414_v51 = vpop.f32.mrf.mxu1 }
  0xe8   : > { %v385_v35 = vadd.f32 %v384_v22, %v272_v26  ;;  %v419_v44 = vmax.f32 %v383_v37, 0.0  ;;  %v415_v12 = vadd.f32 %v414_v51, %v302_v4  ;;  %v431_v20 = vmax.f32 %v413_v9, 0.0 }
  0xe9   : > { %v388_v24 = vpop.f32.mrf.mxu0 }
  0xea   : > { %v389_v33 = vadd.f32 %v388_v24, %v277_v28  ;;  %v420_v43 = vmax.f32 %v385_v35, 0.0 }
  0xeb   : > { %v390_v25 = vpop.f32.mrf.mxu0 }
  0xec   : > { %v391_v31 = vadd.f32 %v390_v25, %v277_v28  ;;  %v421_v42 = vmax.f32 %v389_v33, 0.0 }
  0xed   : > { %v392_v27 = vpop.f32.mrf.mxu0 }
  0xee   : > { %v393_v29 = vadd.f32 %v392_v27, %v282_v23  ;;  %v422_v40 = vmax.f32 %v391_v31, 0.0 }
  0xef   : > { %v394_v30 = vpop.f32.mrf.mxu0 }
  0xf0   : > { %v395_v32 = vadd.f32 %v394_v30, %v282_v23  ;;  %v423_v38 = vmax.f32 %v393_v29, 0.0  ;;  %v432_v23 = vmax.f32 %v415_v12, 0.0 }
  0xf1   : > { %v398_v57 = vpop.f32.mrf.mxu0 }
  0xf2   : > { %v424_v36 = vmax.f32 %v395_v32, 0.0  ;;  %v399_v10 = vadd.f32 %v398_v57, %v287_v61 }
  0xf3   : > { %v400_v62 = vpop.f32.mrf.mxu0 }
  0xf4   : > { %462 = vmatprep.subr.mxu1 %v424_v36  ;;  %v401_v13 = vadd.f32 %v400_v62, %v287_v61  ;;  %v425_v21 = vmax.f32 %v399_v10, 0.0 }
  0xf5   : > { %463 = vmatpush1.msra.mxu1 %v423_v38  ;;  %v402_v1 = vpop.f32.mrf.mxu0 }
  0xf6   : > { %464 = vmatprep.subr.mxu1 %v422_v40  ;;  %v403_v11 = vadd.f32 %v402_v1, %v292_v63  ;;  %v426_v24 = vmax.f32 %v401_v13, 0.0 }
  0xf7   : > { %465 = vmatpush1.msra.mxu1 %v421_v42  ;;  %v404_v5 = vpop.f32.mrf.mxu0 }
  0xf8   : > { %466 = vmatprep.subr.mxu1 %v420_v43  ;;  %v405_v14 = vadd.f32 %v404_v5, %v292_v63  ;;  %v427_v22 = vmax.f32 %v403_v11, 0.0 }
  0xf9   : > { %467 = vmatpush1.msra.mxu1 %v419_v44 }
  0xfa   : > { %468 = vmatprep.subr.mxu1 %v418_v45  ;;  %v428_v25 = vmax.f32 %v405_v14, 0.0 }
  0xfb   : > { %469 = vmatpush1.msra.mxu1 %v417_v46 }
  0xfc   : > { %686 = vmatmul.mubr.msk.f32.vlgmr.msra.gmra.mxu1 %vm434_vm2, %v433_v47 }
 0x1bc   : > { %v504_v52 = vpop.f32.mrf.mxu1 }
 0x1bd   : > { %v687_v53 = vmul.f32 -1.442695, %v504_v52 }
 0x1be   : > { %v506_v54 = vpop.f32.mrf.mxu1 }
 0x1bf   : > { %772 = vpow2.f32 %v687_v53  ;;  %v688_v55 = vmul.f32 -1.442695, %v506_v54 }
 0x1c1   : > { %774 = vpow2.f32 %v688_v55 }
 0x1cc   : > { %v773_v56 = vpop.eup %772 }
 0x1cd   : > { %v515_v58 = vadd.f32 1.0, %v773_v56 }
 0x1ce   : > { %v775_v59 = vpop.eup %774 }
 0x1cf   : > { %776 = vrcp.f32 %v515_v58  ;;  %v516_v60 = vadd.f32 1.0, %v775_v59 }
 0x1d1   : > { %778 = vrcp.f32 %v516_v60 }
 0x1dc   : > { %v777_v15 = vpop.eup %776 }
 0x1dd   : > { %v524_v17 = vrot.slane %v777_v15, %v523_v7 }
 0x1de   : > { %v779_v18 = vpop.eup %778 }
 0x1df   : > { %v528_v26 = vrot.slane %v779_v18, %v523_v7  ;;  %v529_v27 = vmul.f32 %v524_v17, %v425_v21  ;;  %v531_v28 = vmul.f32 %v524_v17, %v427_v22  ;;  %v533_v29 = vmul.f32 %v524_v17, %v429_v16 }
 0x1e0   : > { %v535_v30 = vmul.f32 %v524_v17, %v431_v20 }
 0x1e1   : > { %v530_v31 = vmul.f32 %v528_v26, %v426_v24  ;;  %v532_v32 = vmul.f32 %v528_v26, %v428_v25  ;;  %v534_v33 = vmul.f32 %v528_v26, %v430_v19  ;;  %v536_v34 = vmul.f32 %v528_v26, %v432_v23 }
 0x1e3   : > { %v699_v35 = vpack.c.bf16 %v530_v31, %v529_v27  ;;  %v700_v36 = vpack.c.bf16 %v532_v32, %v531_v28  ;;  %v701_v37 = vpack.c.bf16 %v534_v33, %v533_v29  ;;  %v702_v38 = vpack.c.bf16 %v536_v34, %v535_v30 }
 0x1e5   : > { %561 = vst [vmem:[%s226_s7] sm:$0xff] %v699_v35  ;;  %562 = vst [vmem:[%s226_s7 + $0x8] sm:$0xff] %v700_v36 }
 0x1e6   : > { %563 = vst [vmem:[%s226_s7 + $0x10] sm:$0xff] %v701_v37  ;;  %564 = vst [vmem:[%s226_s7 + $0x18] sm:$0xff] %v702_v38 }
 0x1e7   : > { %793 = shalt.err (!%p790_p5)
}
 0x1e8   : > { %s794_s22 = scalar_lea.hbm %s998_s11, 512  ;;  %s798_s30 = scalar_lea.hbm %s1053_s4, 1024 }
 0x1e9   : > { %p795_p6 = scmp.ne.s32.totalorder %s998_s11, %s794_s22  ;;  %p799_p10 = scmp.lt.s32.totalorder %s998_s11, %s1053_s4 }
 0x1ea   : > { %p800_p11 = scmp.lt.s32.totalorder %s798_s30, %s794_s22 }
 0x1eb   : > { %p796_p7 = pnand %p795_p6, %p928_p4 }
 0x1ec   : > { %p801_p12 = por %p800_p11, %p799_p10 }
 0x1ed   : > { %p797_p9 = pneg %p796_p7 }
 0x1ef   : > { %p802_p13 = pnand %p801_p12, %p797_p9 }
 0x1f1   : > { %805 = shalt.err (!%p802_p13)
}
 0x1f2   : > { %s861_s6 = smov 128   ;;  %s862_s7 = smov 8  }
 0x1f3   : > { %706 = dma.vmem_to_hbm [thread:$0]  (%p928_p4), %s1000_s8, 512, %s998_s11, %s1004_s18, %s861_s6, %s861_s6, %s862_s7  }
 0x1f4 PF: > { %p712_p0 = scmp.ge.s32.totalorder %s856_s20, 2  ;;  %s596_s9 = sand.u32 1, %s836_s15  }
 0x1f5   : > { %s597_s10 = scalar_lea.sflag [#allocation3], %s596_s9 }
 0x1f6   : > { %p709_p1 = pnand %p712_p0, %p935_p8 }
 0x1f8   : > { %p710_p2 = pneg %p709_p1 }
 0x1fa   : > { %831 = dma.done.wait (%p710_p2), %s597_s10, 512  }
 0x1fb   : > { %833 = vsyncadd (%p710_p2), %s597_s10, 4294966784  ;;  %s17_s20 = sadd.s32 1, %s856_s20   ;;  %s1056_s15 = smov %s840_s16 }
 0x1fc   : > { %p14_p3 = scmp.ge.s32.totalorder %s17_s20, 4   ;;  %s1057_s16 = smov %s844_s17 }
 0x1fd   : > { %s1058_s17 = smov %s941_s28  ;;  %s1059_s18 = smov %s852_s19 }
 0x1fe   : > { %s1060_s19 = smov %s1062_s23  ;;  %16 = sbr.rel (!%p14_p3) target bundleno = 4 (0x4), region = 74 }
 0x203   :  { %602 = vsyncpa [#allocation3], 1 }
 0x204   :  { %604 = vsyncpa [#allocation3 + $0x1], 1 }

</bundles_post_ra>
